<compile_context>
chip_gen: v7x
topology: tpu7x:2x2x1
jax: 0.10.0
libtpu: 0.0.40
codegen_flags: <defaults>
</compile_context>

<pallas_src>
import functools

import jax
import jax.numpy as jnp
from jax import lax
from jax.experimental import pallas as pl
from jax.experimental.pallas import tpu as pltpu

NUM_PANELS, NUM_SENTENCES, NUM_WORDS = 4, 3, 20
D_EMB_WORD = 300  # hard-coded in the torch module (nn.Embedding(word_dim, 300))
VMEM_LIMIT = 48 * 1024 * 1024  # explicit scoped-VMEM limit (fits v7x's 64 MiB)

VGG_CFG = [64, 64, 'M', 128, 128, 'M', 256, 256, 256, 'M',
           512, 512, 512, 'M', 512, 512, 512, 'M']


# ---------------------------------------------------------------------------
# Tile selection: full-extent blocks for small / unaligned dims (always legal),
# otherwise the largest `align`-multiple divisor <= cap.  Because the tile
# either divides the dim or equals it, no padding or output slicing is needed.
# ---------------------------------------------------------------------------
def _tile(dim, align, cap):
    if dim <= cap:
        return dim
    for t in range(cap, align - 1, -align):
        if dim % t == 0:
            return t
    return dim  # no aligned divisor: fall back to a full-extent block


# ---------------------------------------------------------------------------
# Generic tiled matmul with fused bias + optional ReLU.
# bf16 operands -> f32 MXU accumulation.  Used for every Linear (VGG classifier,
# img_fc0, fc0) and the LSTM input projection.
# ---------------------------------------------------------------------------
def _mm_single_kernel(x_ref, w_ref, b_ref, o_ref, *, relu):
    r = jnp.dot(x_ref[...], w_ref[...], preferred_element_type=jnp.float32)
    r = r + b_ref[...]
    if relu:
        r = jnp.maximum(r, 0.0)
    o_ref[...] = r.astype(o_ref.dtype)


def _mm_multi_kernel(x_ref, w_ref, b_ref, o_ref, acc_ref, *, relu):
    # Accumulate in a VMEM f32 scratch; write the (possibly bf16) output block
    # only at the last k step with bias+ReLU+cast fused (no f32 HBM round trip).
    @pl.when(pl.program_id(2) == 0)
    def _():
        acc_ref[...] = jnp.zeros_like(acc_ref)

    acc_ref[...] += jnp.dot(x_ref[...], w_ref[...], preferred_element_type=jnp.float32)

    @pl.when(pl.program_id(2) == pl.num_programs(2) - 1)
    def _():
        r = acc_ref[...] + b_ref[...]
        if relu:
            r = jnp.maximum(r, 0.0)
        o_ref[...] = r.astype(o_ref.dtype)


def matmul_bias(x, w, b, relu=False, out_dtype=jnp.float32):
    """(M,K) @ (K,N) + (N,) -> (M,N), MXU-tiled, bf16 inputs / f32 accumulation."""
    M, K = x.shape
    Kw, N = w.shape
    assert K == Kw, (K, Kw)
    xb = x.astype(jnp.bfloat16)
    wb = w.astype(jnp.bfloat16)               # no-op: weights are pre-cast at init
    bb = b.astype(jnp.float32).reshape(1, N)

    tm = _tile(M, 8, 512)
    tk = _tile(K, 128, 2048)
    tn = _tile(N, 128, 512)
    grid = (M // tm, N // tn, K // tk)
    nk = grid[2]

    if nk == 1:
        kern = functools.partial(_mm_single_kernel, relu=relu)
        scratch = []
        w_spec = pl.BlockSpec((tk, tn), lambda i, j, k: (k, j))
    else:
        kern = functools.partial(_mm_multi_kernel, relu=relu)
        scratch = [pltpu.VMEM((tm, tn), jnp.float32)]
        # Weight-streaming regime (M is tiny): triple-buffer the weight stream.
        w_spec = pl.BlockSpec((tk, tn), lambda i, j, k: (k, j),
                              pipeline_mode=pl.Buffered(3))

    return pl.pallas_call(
        kern,
        out_shape=jax.ShapeDtypeStruct((M, N), out_dtype),
        grid_spec=pltpu.PrefetchScalarGridSpec(
            num_scalar_prefetch=0,
            grid=grid,
            in_specs=[
                pl.BlockSpec((tm, tk), lambda i, j, k: (i, k)),
                w_spec,
                pl.BlockSpec((1, tn), lambda i, j, k: (0, j)),
            ],
            out_specs=pl.BlockSpec((tm, tn), lambda i, j, k: (i, j)),
            scratch_shapes=scratch,
        ),
        compiler_params=pltpu.CompilerParams(
            dimension_semantics=("parallel", "parallel", "arbitrary"),
            vmem_limit_bytes=VMEM_LIMIT),
    )(xb, wb, bb)


# ---------------------------------------------------------------------------
# Fused 3x3 SAME conv + bias + ReLU (VGG16 conv layers).
#
# The wrapper zero-pads the NHWC activation to (P, H+3, W+2, Cin) and flattens
# the spatial dims to rows: row r = h*(W+2)+w.  In that layout, conv tap
# (dh, dw) of output pixel (i, j) reads input row  (i*(W+2)+j) + dh*(W+2)+dw,
# i.e. a CONSTANT row offset per tap, so the kernel is 9 shifted, accumulating
# 2D matmuls entirely in VMEM - the 9x im2col patch tensor never exists in HBM.
# The output is produced in the same padded-row layout; its 2 garbage columns
# per row are dropped by the (XLA-fused) repack pass that also applies the
# 2x2 maxpool and the next layer's padding.
# TODO(synk): chain the padded layout across layers (mask the garbage columns
# to zero in the epilogue) to drop the per-layer repack pass entirely.
# ---------------------------------------------------------------------------
def _conv3x3_kernel(x_ref, w_ref, b_ref, o_ref, *, taps, rout, tp):
    # x_ref: (tp, Rin, Cin) bf16   w_ref: (9, Cin, tn) bf16
    # b_ref: (1, tn) f32           o_ref: (tp, Rout, tn) bf16
    bias = b_ref[...]
    for p in range(tp):                       # static unroll over panels in block
        xp = x_ref[p]                         # (Rin, Cin)
        acc = jnp.dot(xp[taps[0]:taps[0] + rout, :], w_ref[0],
                      preferred_element_type=jnp.float32)
        for t in range(1, 9):
            off = taps[t]
            acc = acc + jnp.dot(xp[off:off + rout, :], w_ref[t],
                                preferred_element_type=jnp.float32)
        acc = jnp.maximum(acc + bias, 0.0)    # fused bias + ReLU epilogue
        o_ref[p] = acc.astype(o_ref.dtype)


def conv3x3_relu(x, w9, b, pool):
    """x: (P, H, W, Cin) -> ReLU(conv3x3_same(x) + b), optionally 2x2-maxpooled."""
    P, H, W, Cin = x.shape
    Cout = w9.shape[-1]
    Wp = W + 2
    Rin = (H + 3) * Wp                        # +1 top / +2 bottom rows cover all taps
    Rout = H * Wp
    taps = tuple(dh * Wp + dw for dh in range(3) for dw in range(3))

    xf = jnp.pad(x.astype(jnp.bfloat16), ((0, 0), (1, 2), (1, 1), (0, 0)))
    xf = xf.reshape(P, Rin, Cin)

    # >=2 parallel blocks so both v7x TensorCores get work (harmless on 1-TC
    # chips): split panels for cheap-weight layers, split Cout for >=256.
    if Cout >= 256:
        tp, tn = P, Cout // 2
    elif P % 2 == 0:
        tp, tn = P // 2, Cout
    else:
        tp, tn = P, Cout
    grid = (P // tp, Cout // tn)

    kern = functools.partial(_conv3x3_kernel, taps=taps, rout=Rout, tp=tp)
    out = pl.pallas_call(
        kern,
        out_shape=jax.ShapeDtypeStruct((P, Rout, Cout), jnp.bfloat16),
        grid_spec=pltpu.PrefetchScalarGridSpec(
            num_scalar_prefetch=0,
            grid=grid,
            in_specs=[
                pl.BlockSpec((tp, Rin, Cin), lambda i, j: (i, 0, 0)),
                pl.BlockSpec((9, Cin, tn), lambda i, j: (0, 0, j)),
                pl.BlockSpec((1, tn), lambda i, j: (0, j)),
            ],
            out_specs=pl.BlockSpec((tp, Rout, tn), lambda i, j: (i, 0, j)),
        ),
        compiler_params=pltpu.CompilerParams(
            dimension_semantics=("parallel", "parallel"),
            vmem_limit_bytes=VMEM_LIMIT),
    )(xf, w9.astype(jnp.bfloat16), b.astype(jnp.float32).reshape(1, Cout))

    # Single XLA repack pass per layer: drop the 2 garbage columns, (maxpool),
    # and the next conv3x3_relu's pad/reshape fuses into the same pass.
    y = out.reshape(P, H, Wp, Cout)[:, :, :W, :]
    if pool:
        y = y.reshape(P, H // 2, 2, W // 2, 2, Cout).max(axis=(2, 4))
    return y


# ---------------------------------------------------------------------------
# Embedding lookup + sum over the words axis (emb_word -> emb_sentence).
# sum_j table[words[s, j]]  ==  counts[s, :] @ table  (counts built in-kernel).
# ---------------------------------------------------------------------------
def _emb_bag_sum_kernel(words_ref, table_ref, o_ref, *, n_words, vocab):
    w = words_ref[...]                                   # (S, n_words) int32
    s = w.shape[0]
    iota = lax.broadcasted_iota(jnp.int32, (s, vocab), 1)
    counts = jnp.zeros((s, vocab), jnp.float32)
    for j in range(n_words):                             # tiny: ~2 vreg ops per word
        counts = counts + (w[:, j:j + 1] == iota).astype(jnp.float32)
    r = jnp.dot(counts.astype(jnp.bfloat16), table_ref[...],  # bf16 MXU path
                preferred_element_type=jnp.float32)
    o_ref[...] = r.astype(o_ref.dtype)


def emb_bag_sum(words_2d, table):
    s, n_words = words_2d.shape
    vocab, d_emb = table.shape
    kern = functools.partial(_emb_bag_sum_kernel, n_words=n_words, vocab=vocab)
    # TODO(synk): for realistic vocab sizes (>=32k) keep the table in HBM
    # (memory_space=pl.ANY) and DMA-gather only the <=20 referenced rows per
    # sentence instead of the one-hot counts@table path (needed on v7x 64 MiB).
    return pl.pallas_call(
        kern, out_shape=jax.ShapeDtypeStruct((s, d_emb), jnp.bfloat16)
    )(words_2d.astype(jnp.int32), table.astype(jnp.bfloat16))


# ---------------------------------------------------------------------------
# Single-layer unidirectional LSTM (batch_first, zero initial state), returning
# only the last timestep hidden state (what the torch module uses).
# Input projections for all T steps / 4 gates are ONE MXU matmul; the recurrence
# uses gate-major weight slabs (4, d_h, d_h) so gate selection is a major-axis
# index (no cross-lane slices at 300/600/900).  PyTorch gate order: i, f, g, o.
# ---------------------------------------------------------------------------
def _lstm_last_kernel(xp_ref, whh_ref, o_ref, *, t_steps):
    # xp_ref: (T, 4, n, d_h) f32 ; whh_ref: (4, d_h, d_h) bf16 ; o_ref: (n, d_h)
    n, d_h = o_ref.shape
    h = jnp.zeros((n, d_h), jnp.float32)
    c = jnp.zeros((n, d_h), jnp.float32)
    for t in range(t_steps):                             # static unroll, T == 3
        hb = h.astype(jnp.bfloat16)
        gi = xp_ref[t, 0] + jnp.dot(hb, whh_ref[0], preferred_element_type=jnp.float32)
        gf = xp_ref[t, 1] + jnp.dot(hb, whh_ref[1], preferred_element_type=jnp.float32)
        gg = xp_ref[t, 2] + jnp.dot(hb, whh_ref[2], preferred_element_type=jnp.float32)
        go = xp_ref[t, 3] + jnp.dot(hb, whh_ref[3], preferred_element_type=jnp.float32)
        i = jax.nn.sigmoid(gi)
        f = jax.nn.sigmoid(gf)
        g = jnp.tanh(gg)
        o = jax.nn.sigmoid(go)
        c = f * c + i * g
        h = o * jnp.tanh(c)
    o_ref[...] = h.astype(o_ref.dtype)


def lstm_last(x_flat, wih_cat, whh_gates, b_cat, n_seq, t_steps, d_h):
    """x_flat rows ordered (sequence-major, time-minor): row = seq * T + t."""
    xproj = matmul_bias(x_flat, wih_cat, b_cat, relu=False)        # (n*T, 4*d_h) f32
    # -> (T, 4, n, d_h): gate-major layout, tiny wrapper transpose.
    xproj = xproj.reshape(n_seq, t_steps, 4, d_h).transpose(1, 2, 0, 3)
    kern = functools.partial(_lstm_last_kernel, t_steps=t_steps)
    return pl.pallas_call(
        kern, out_shape=jax.ShapeDtypeStruct((n_seq, d_h), jnp.bfloat16)
    )(xproj, whh_gates.astype(jnp.bfloat16))


# ---------------------------------------------------------------------------
# VGG16 feature extractor + classifier (minus last Linear).
# ---------------------------------------------------------------------------
def vgg_forward(x, params):
    """x: (N, H, W, 3) NHWC -> (N, 4096) bf16 VGG16 features (classifier[:-1])."""
    x = x.astype(jnp.bfloat16)
    conv_i = 0
    for idx, v in enumerate(VGG_CFG):
        if v == 'M':
            continue
        pool_after = (idx + 1 < len(VGG_CFG)) and (VGG_CFG[idx + 1] == 'M')
        w9, b_c = params['vgg_conv'][conv_i]
        conv_i += 1
        x = conv3x3_relu(x, w9, b_c, pool=pool_after)     # fused conv+bias+ReLU(+pool)

    # AdaptiveAvgPool2d((7, 7))
    n, h, w, c = x.shape
    if h == 7 and w == 7:
        pooled = x
    elif h == 1 and w == 1:
        pooled = jnp.broadcast_to(x, (n, 7, 7, c))        # adaptive pool replicates 1x1
    elif h % 7 == 0 and w % 7 == 0:
        s = h // 7
        pooled = (x.reshape(n, 7, s, 7, s, c).astype(jnp.float32)
                  .mean(axis=(2, 4)).astype(x.dtype))
    else:
        # TODO(synk): general adaptive-avg-pool bin boundaries for arbitrary H, W.
        raise ValueError("unsupported spatial size for adaptive avg pool")

    # NOTE: NHWC flatten; real torchvision checkpoints order fc1 rows by NCHW.
    flat = pooled.reshape(n, 7 * 7 * c)
    h1 = matmul_bias(flat, params['vgg_fc1_w'], params['vgg_fc1_b'], relu=True,
                     out_dtype=jnp.bfloat16)
    # nn.Dropout -> identity (inference)
    h2 = matmul_bias(h1, params['vgg_fc2_w'], params['vgg_fc2_b'], relu=True,
                     out_dtype=jnp.bfloat16)
    return h2


# ---------------------------------------------------------------------------
# Full Embedding.forward
# ---------------------------------------------------------------------------
def embedding_forward(params, images, words):
    b = words.shape[0]
    d_word = params['lstm_whh'].shape[-1]
    d_hidden = params['img_fc0_b'].shape[0]
    d_embedding = params['fc0_b'].shape[0]
    h_img, w_img = images.shape[-2], images.shape[-1]

    # ---------------- text branch ----------------
    words_2d = words.astype(jnp.int32).reshape(-1, NUM_WORDS)        # (B*4*3, 20)
    emb_sentence = emb_bag_sum(words_2d, params['emb'])              # (B*4*3, 300) bf16
    h_last = lstm_last(emb_sentence, params['lstm_wih'], params['lstm_whh'],
                       params['lstm_b'], n_seq=b * NUM_PANELS,
                       t_steps=NUM_SENTENCES, d_h=d_word)            # (B*4, d_word) bf16
    emb_panel_sentence = h_last.reshape(b, NUM_PANELS, d_word)

    # ---------------- image branch ----------------
    imgs = images.reshape(b * NUM_PANELS, 3, h_img, w_img)
    imgs = jnp.transpose(imgs, (0, 2, 3, 1))                         # NCHW -> NHWC
    feats = vgg_forward(imgs, params)                                # (B*4, 4096) bf16
    img_feature = matmul_bias(feats, params['img_fc0_w'], params['img_fc0_b'],
                              relu=True, out_dtype=jnp.bfloat16)     # (B*4, d_hidden)
    img_feature = img_feature.reshape(b, NUM_PANELS, d_hidden)

    # ---------------- fusion ----------------
    fusion = jnp.concatenate([img_feature, emb_panel_sentence], axis=-1)  # bf16
    out = matmul_bias(fusion.reshape(b * NUM_PANELS, d_hidden + d_word),
                      params['fc0_w'], params['fc0_b'], relu=True)   # f32 module output
    return out.reshape(b, NUM_PANELS, d_embedding)


# ---------------------------------------------------------------------------
# Deterministic parameter initialization (synthetic; matches the module shapes).
# Weights are pre-cast to bf16 ONCE here (no per-forward casts of big constants).
# ---------------------------------------------------------------------------
def init_params(key, d_embedding, d_word, d_hidden, word_dim):
    assert d_word == D_EMB_WORD, "module's .view(..., d_word) requires d_word == 300"
    params = {}
    # nn.Embedding(word_dim, 300): the module overwrites emb.weight.data with
    # torch.ones, so the padding_idx=0 row is also ones at forward time.
    params['emb'] = jnp.ones((word_dim, D_EMB_WORD), jnp.float32)

    # VGG16 convs (pretrained=False -> synthetic init); tap-major (9, Cin, Cout):
    # w9[kh*3+kw] == torch_weight[:, :, kh, kw].T
    conv_params = []
    c_in = 3
    for v in VGG_CFG:
        if v == 'M':
            continue
        key, kw = jax.random.split(key)
        fan_in = 9 * c_in
        w = jax.random.normal(kw, (9, c_in, v), jnp.float32) * (fan_in ** -0.5)
        conv_params.append((w.astype(jnp.bfloat16), jnp.zeros((v,), jnp.float32)))
        c_in = v
    params['vgg_conv'] = conv_params

    # VGG classifier (last Linear removed by the module)
    key, k1, k2 = jax.random.split(key, 3)
    params['vgg_fc1_w'] = (jax.random.normal(k1, (512 * 7 * 7, 4096), jnp.float32)
                           * (25088 ** -0.5)).astype(jnp.bfloat16)
    params['vgg_fc1_b'] = jnp.zeros((4096,), jnp.float32)
    params['vgg_fc2_w'] = (jax.random.normal(k2, (4096, 4096), jnp.float32)
                           * (4096 ** -0.5)).astype(jnp.bfloat16)
    params['vgg_fc2_b'] = jnp.zeros((4096,), jnp.float32)

    # box_lstm: nn.LSTM(300, d_word), gate order (i, f, g, o):
    #  * lstm_wih = W_ih.T with gate-major columns -> (300, 4*d_word)
    #  * lstm_whh = per-gate W_hh[g].T slabs stacked on a major axis -> (4, d_word, d_word)
    #  * lstm_b  = b_ih + b_hh for a real checkpoint.
    key, k1, k2, k3 = jax.random.split(key, 4)
    s = d_word ** -0.5
    params['lstm_wih'] = jax.random.uniform(
        k1, (D_EMB_WORD, 4 * d_word), jnp.float32, -s, s).astype(jnp.bfloat16)
    params['lstm_whh'] = jax.random.uniform(
        k2, (4, d_word, d_word), jnp.float32, -s, s).astype(jnp.bfloat16)
    params['lstm_b'] = jax.random.uniform(k3, (4 * d_word,), jnp.float32, -s, s)

    # img_fc0: Linear(4096, d_hidden)+ReLU ; fc0: Linear(d_word+d_hidden, d_embedding)+ReLU
    key, k1, k2 = jax.random.split(key, 3)
    params['img_fc0_w'] = (jax.random.normal(k1, (4096, d_hidden), jnp.float32)
                           * (4096 ** -0.5)).astype(jnp.bfloat16)
    params['img_fc0_b'] = jnp.zeros((d_hidden,), jnp.float32)
    params['fc0_w'] = (jax.random.normal(k2, (d_word + d_hidden, d_embedding), jnp.float32)
                       * ((d_word + d_hidden) ** -0.5)).astype(jnp.bfloat16)
    params['fc0_b'] = jnp.zeros((d_embedding,), jnp.float32)
    return params


if __name__ == "__main__":
    key = jax.random.PRNGKey(0)
    k_img, k_words, k_params, k_t1, k_t2, k_t3 = jax.random.split(key, 6)

    # --- numerics self-check: fused 3x3 conv kernel vs lax.conv (bf16-matched) ---
    xt = jax.random.normal(k_t1, (2, 8, 8, 16), jnp.float32)
    xt = xt.astype(jnp.bfloat16).astype(jnp.float32)
    wt = (jax.random.normal(k_t2, (9, 16, 32), jnp.float32) * (144 ** -0.5)
          ).astype(jnp.bfloat16)
    bt = jnp.zeros((32,), jnp.float32)
    got = conv3x3_relu(xt, wt, bt, pool=False).astype(jnp.float32)
    ref = jax.lax.conv_general_dilated(
        xt, wt.astype(jnp.float32).reshape(3, 3, 16, 32), (1, 1), 'SAME',
        dimension_numbers=('NHWC', 'HWIO', 'NHWC'))
    ref = jnp.maximum(ref, 0.0)
    err = float(jnp.max(jnp.abs(got - ref)) / (jnp.max(jnp.abs(ref)) + 1e-6))
    assert err < 0.05, f"conv kernel mismatch: rel err {err}"

    # --- numerics self-check: multi-K matmul (VMEM scratch acc + Buffered(3)) ---
    xm = jax.random.normal(k_t3, (8, 4096), jnp.float32)
    xm = xm.astype(jnp.bfloat16).astype(jnp.float32)
    wm = (jax.random.normal(k_t1, (4096, 256), jnp.float32) * (4096 ** -0.5)
          ).astype(jnp.bfloat16)
    bm = jnp.zeros((256,), jnp.float32)
    gotm = matmul_bias(xm, wm, bm, relu=True)
    refm = jnp.maximum(xm @ wm.astype(jnp.float32) + bm, 0.0)
    errm = float(jnp.max(jnp.abs(gotm - refm)) / (jnp.max(jnp.abs(refm)) + 1e-6))
    assert errm < 0.05, f"matmul kernel mismatch: rel err {errm}"

    # --- full forward -----------------------------------------------------------
    B = 2
    H = W = 32                   # VGG pools 32 -> 1; adaptive avg pool replicates to 7x7
    d_embedding, d_word, d_hidden, word_dim = 32, 300, 64, 10

    images = jax.random.normal(k_img, (B, NUM_PANELS, 3, H, W), jnp.float32)
    words = jax.random.randint(k_words, (B, NUM_PANELS, NUM_SENTENCES, NUM_WORDS),
                               0, word_dim, jnp.int32)
    params = init_params(k_params, d_embedding, d_word, d_hidden, word_dim)

    fwd = jax.jit(embedding_forward)
    out = jax.block_until_ready(fwd(params, images, words))

    assert out.shape == (B, NUM_PANELS, d_embedding), out.shape
    assert bool(jnp.all(jnp.isfinite(out)))
    print("KERNEL_OK")
</pallas_src>

<mosaic_0001>
module attributes {stable_mosaic.version = 11 : i64} {
  func.func @_conv3x3_kernel(%arg0: i32, %arg1: i32, %arg2: memref<1x110x16xbf16, #tpu.memory_space<vmem>>, %arg3: memref<9x16x32xbf16, #tpu.memory_space<vmem>>, %arg4: memref<1x32xf32, #tpu.memory_space<vmem>>, %arg5: memref<1x80x32xbf16, #tpu.memory_space<vmem>>) attributes {dimension_semantics = [#tpu.dimension_semantics<parallel>, #tpu.dimension_semantics<parallel>], iteration_bounds = array<i64: 2, 1>, scalar_prefetch = 0 : i64, scratch_operands = 0 : i64, tpu.core_type = #tpu.core_type<tc>, window_params = [{transform_indices = @transform_0, window_bounds = array<i64: 1, 110, 16>}, {transform_indices = @transform_1, window_bounds = array<i64: 9, 16, 32>}, {transform_indices = @transform_2, window_bounds = array<i64: 1, 32>}, {transform_indices = @transform_3, window_bounds = array<i64: 1, 80, 32>}]} {
    %c0 = arith.constant 0 : index
    %c0_0 = arith.constant 0 : index
    %0 = vector.load %arg4[%c0, %c0_0] : memref<1x32xf32, #tpu.memory_space<vmem>>, vector<1x32xf32>
    %c0_1 = arith.constant 0 : index
    %c0_2 = arith.constant 0 : index
    %c0_3 = arith.constant 0 : index
    %1 = vector.load %arg2[%c0_1, %c0_2, %c0_3] : memref<1x110x16xbf16, #tpu.memory_space<vmem>>, vector<1x110x16xbf16>
    %2 = vector.shape_cast %1 : vector<1x110x16xbf16> to vector<110x16xbf16>
    %3 = vector.extract_strided_slice %2 {offsets = [0, 0], sizes = [80, 16], strides = [1, 1]} : vector<110x16xbf16> to vector<80x16xbf16>
    %c0_4 = arith.constant 0 : index
    %c0_5 = arith.constant 0 : index
    %c0_6 = arith.constant 0 : index
    %4 = vector.load %arg3[%c0_4, %c0_5, %c0_6] : memref<9x16x32xbf16, #tpu.memory_space<vmem>>, vector<1x16x32xbf16>
    %5 = vector.shape_cast %4 : vector<1x16x32xbf16> to vector<16x32xbf16>
    %cst = arith.constant dense<0.000000e+00> : vector<80x32xf32>
    %6 = tpu.matmul %3, %5, %cst {dimension_numbers = #tpu.dot_dimension_numbers<[1], [0], [0], [1], [0, 0, 1, 1], [], []>} : vector<80x16xbf16>, vector<16x32xbf16>, vector<80x32xf32> -> vector<80x32xf32>
    %7 = vector.extract_strided_slice %2 {offsets = [1, 0], sizes = [80, 16], strides = [1, 1]} : vector<110x16xbf16> to vector<80x16xbf16>
    %c1 = arith.constant 1 : index
    %c0_7 = arith.constant 0 : index
    %c0_8 = arith.constant 0 : index
    %8 = vector.load %arg3[%c1, %c0_7, %c0_8] : memref<9x16x32xbf16, #tpu.memory_space<vmem>>, vector<1x16x32xbf16>
    %9 = vector.shape_cast %8 : vector<1x16x32xbf16> to vector<16x32xbf16>
    %cst_9 = arith.constant dense<0.000000e+00> : vector<80x32xf32>
    %10 = tpu.matmul %7, %9, %cst_9 {dimension_numbers = #tpu.dot_dimension_numbers<[1], [0], [0], [1], [0, 0, 1, 1], [], []>} : vector<80x16xbf16>, vector<16x32xbf16>, vector<80x32xf32> -> vector<80x32xf32>
    %11 = arith.addf %6, %10 : vector<80x32xf32>
    %12 = vector.extract_strided_slice %2 {offsets = [2, 0], sizes = [80, 16], strides = [1, 1]} : vector<110x16xbf16> to vector<80x16xbf16>
    %c2 = arith.constant 2 : index
    %c0_10 = arith.constant 0 : index
    %c0_11 = arith.constant 0 : index
    %13 = vector.load %arg3[%c2, %c0_10, %c0_11] : memref<9x16x32xbf16, #tpu.memory_space<vmem>>, vector<1x16x32xbf16>
    %14 = vector.shape_cast %13 : vector<1x16x32xbf16> to vector<16x32xbf16>
    %cst_12 = arith.constant dense<0.000000e+00> : vector<80x32xf32>
    %15 = tpu.matmul %12, %14, %cst_12 {dimension_numbers = #tpu.dot_dimension_numbers<[1], [0], [0], [1], [0, 0, 1, 1], [], []>} : vector<80x16xbf16>, vector<16x32xbf16>, vector<80x32xf32> -> vector<80x32xf32>
    %16 = arith.addf %11, %15 : vector<80x32xf32>
    %17 = vector.extract_strided_slice %2 {offsets = [10, 0], sizes = [80, 16], strides = [1, 1]} : vector<110x16xbf16> to vector<80x16xbf16>
    %c3 = arith.constant 3 : index
    %c0_13 = arith.constant 0 : index
    %c0_14 = arith.constant 0 : index
    %18 = vector.load %arg3[%c3, %c0_13, %c0_14] : memref<9x16x32xbf16, #tpu.memory_space<vmem>>, vector<1x16x32xbf16>
    %19 = vector.shape_cast %18 : vector<1x16x32xbf16> to vector<16x32xbf16>
    %cst_15 = arith.constant dense<0.000000e+00> : vector<80x32xf32>
    %20 = tpu.matmul %17, %19, %cst_15 {dimension_numbers = #tpu.dot_dimension_numbers<[1], [0], [0], [1], [0, 0, 1, 1], [], []>} : vector<80x16xbf16>, vector<16x32xbf16>, vector<80x32xf32> -> vector<80x32xf32>
    %21 = arith.addf %16, %20 : vector<80x32xf32>
    %22 = vector.extract_strided_slice %2 {offsets = [11, 0], sizes = [80, 16], strides = [1, 1]} : vector<110x16xbf16> to vector<80x16xbf16>
    %c4 = arith.constant 4 : index
    %c0_16 = arith.constant 0 : index
    %c0_17 = arith.constant 0 : index
    %23 = vector.load %arg3[%c4, %c0_16, %c0_17] : memref<9x16x32xbf16, #tpu.memory_space<vmem>>, vector<1x16x32xbf16>
    %24 = vector.shape_cast %23 : vector<1x16x32xbf16> to vector<16x32xbf16>
    %cst_18 = arith.constant dense<0.000000e+00> : vector<80x32xf32>
    %25 = tpu.matmul %22, %24, %cst_18 {dimension_numbers = #tpu.dot_dimension_numbers<[1], [0], [0], [1], [0, 0, 1, 1], [], []>} : vector<80x16xbf16>, vector<16x32xbf16>, vector<80x32xf32> -> vector<80x32xf32>
    %26 = arith.addf %21, %25 : vector<80x32xf32>
    %27 = vector.extract_strided_slice %2 {offsets = [12, 0], sizes = [80, 16], strides = [1, 1]} : vector<110x16xbf16> to vector<80x16xbf16>
    %c5 = arith.constant 5 : index
    %c0_19 = arith.constant 0 : index
    %c0_20 = arith.constant 0 : index
    %28 = vector.load %arg3[%c5, %c0_19, %c0_20] : memref<9x16x32xbf16, #tpu.memory_space<vmem>>, vector<1x16x32xbf16>
    %29 = vector.shape_cast %28 : vector<1x16x32xbf16> to vector<16x32xbf16>
    %cst_21 = arith.constant dense<0.000000e+00> : vector<80x32xf32>
    %30 = tpu.matmul %27, %29, %cst_21 {dimension_numbers = #tpu.dot_dimension_numbers<[1], [0], [0], [1], [0, 0, 1, 1], [], []>} : vector<80x16xbf16>, vector<16x32xbf16>, vector<80x32xf32> -> vector<80x32xf32>
    %31 = arith.addf %26, %30 : vector<80x32xf32>
    %32 = vector.extract_strided_slice %2 {offsets = [20, 0], sizes = [80, 16], strides = [1, 1]} : vector<110x16xbf16> to vector<80x16xbf16>
    %c6 = arith.constant 6 : index
    %c0_22 = arith.constant 0 : index
    %c0_23 = arith.constant 0 : index
    %33 = vector.load %arg3[%c6, %c0_22, %c0_23] : memref<9x16x32xbf16, #tpu.memory_space<vmem>>, vector<1x16x32xbf16>
    %34 = vector.shape_cast %33 : vector<1x16x32xbf16> to vector<16x32xbf16>
    %cst_24 = arith.constant dense<0.000000e+00> : vector<80x32xf32>
    %35 = tpu.matmul %32, %34, %cst_24 {dimension_numbers = #tpu.dot_dimension_numbers<[1], [0], [0], [1], [0, 0, 1, 1], [], []>} : vector<80x16xbf16>, vector<16x32xbf16>, vector<80x32xf32> -> vector<80x32xf32>
    %36 = arith.addf %31, %35 : vector<80x32xf32>
    %37 = vector.extract_strided_slice %2 {offsets = [21, 0], sizes = [80, 16], strides = [1, 1]} : vector<110x16xbf16> to vector<80x16xbf16>
    %c7 = arith.constant 7 : index
    %c0_25 = arith.constant 0 : index
    %c0_26 = arith.constant 0 : index
    %38 = vector.load %arg3[%c7, %c0_25, %c0_26] : memref<9x16x32xbf16, #tpu.memory_space<vmem>>, vector<1x16x32xbf16>
    %39 = vector.shape_cast %38 : vector<1x16x32xbf16> to vector<16x32xbf16>
    %cst_27 = arith.constant dense<0.000000e+00> : vector<80x32xf32>
    %40 = tpu.matmul %37, %39, %cst_27 {dimension_numbers = #tpu.dot_dimension_numbers<[1], [0], [0], [1], [0, 0, 1, 1], [], []>} : vector<80x16xbf16>, vector<16x32xbf16>, vector<80x32xf32> -> vector<80x32xf32>
    %41 = arith.addf %36, %40 : vector<80x32xf32>
    %42 = vector.extract_strided_slice %2 {offsets = [22, 0], sizes = [80, 16], strides = [1, 1]} : vector<110x16xbf16> to vector<80x16xbf16>
    %c8 = arith.constant 8 : index
    %c0_28 = arith.constant 0 : index
    %c0_29 = arith.constant 0 : index
    %43 = vector.load %arg3[%c8, %c0_28, %c0_29] : memref<9x16x32xbf16, #tpu.memory_space<vmem>>, vector<1x16x32xbf16>
    %44 = vector.shape_cast %43 : vector<1x16x32xbf16> to vector<16x32xbf16>
    %cst_30 = arith.constant dense<0.000000e+00> : vector<80x32xf32>
    %45 = tpu.matmul %42, %44, %cst_30 {dimension_numbers = #tpu.dot_dimension_numbers<[1], [0], [0], [1], [0, 0, 1, 1], [], []>} : vector<80x16xbf16>, vector<16x32xbf16>, vector<80x32xf32> -> vector<80x32xf32>
    %46 = arith.addf %41, %45 : vector<80x32xf32>
    %47 = vector.broadcast %0 : vector<1x32xf32> to vector<80x32xf32>
    %48 = arith.addf %46, %47 : vector<80x32xf32>
    %cst_31 = arith.constant 0.000000e+00 : f32
    %49 = vector.broadcast %cst_31 : f32 to vector<80x32xf32>
    %50 = arith.maximumf %48, %49 : vector<80x32xf32>
    %51 = arith.truncf %50 : vector<80x32xf32> to vector<80x32xbf16>
    %c0_32 = arith.constant 0 : index
    %c0_33 = arith.constant 0 : index
    %c0_34 = arith.constant 0 : index
    %52 = vector.load %arg5[%c0_32, %c0_33, %c0_34] : memref<1x80x32xbf16, #tpu.memory_space<vmem>>, vector<1x80x32xbf16>
    %53 = vector.shape_cast %52 : vector<1x80x32xbf16> to vector<80x32xbf16>
    %54 = vector.shape_cast %51 : vector<80x32xbf16> to vector<1x80x32xbf16>
    tpu.vector_store %arg5[%c0_32, %c0_33, %c0_34], %54 {strides = array<i32>} : memref<1x80x32xbf16, #tpu.memory_space<vmem>>, vector<1x80x32xbf16>,
    return
  }
  func.func @transform_0(%arg0: i32, %arg1: i32) -> (i32, i32, i32) {
    %c0_i32 = arith.constant 0 : i32
    %c0_i32_0 = arith.constant 0 : i32
    %c0_i32_1 = arith.constant 0 : i32
    return %arg0, %c0_i32, %c0_i32_0 : i32, i32, i32
  }
  func.func @transform_1(%arg0: i32, %arg1: i32) -> (i32, i32, i32) {
    %c0_i32 = arith.constant 0 : i32
    %c0_i32_0 = arith.constant 0 : i32
    %c0_i32_1 = arith.constant 0 : i32
    return %c0_i32, %c0_i32_0, %arg1 : i32, i32, i32
  }
  func.func @transform_2(%arg0: i32, %arg1: i32) -> (i32, i32) {
    %c0_i32 = arith.constant 0 : i32
    %c0_i32_0 = arith.constant 0 : i32
    return %c0_i32, %arg1 : i32, i32
  }
  func.func @transform_3(%arg0: i32, %arg1: i32) -> (i32, i32, i32) {
    %c0_i32 = arith.constant 0 : i32
    %c0_i32_0 = arith.constant 0 : i32
    return %arg0, %c0_i32, %arg1 : i32, i32, i32
  }
}

</mosaic_0001>

<bundles_post_ra>
// kernel: tpu_custom_call.1
= control target key start
LH: loop header
LB: loop body
LE: loop exit
PB: predicated region body
PF: predicated region fallthrough
CT: control target
= control target key end

     0   :  { %s2055_s12 = smov 0   ;;  %s2057_s13 = smov 0   ;;  %s2573_s0 = inlined_call_operand.vmem [shape: bf16[2,110,16], index: 0, kind: input, shape index: {}]   ;;  %s2574_s1 = inlined_call_operand.vmem [shape: bf16[9,16,32], index: 1, kind: input, shape index: {}]   ;;  %s2575_s2 = inlined_call_operand.vmem [shape: f32[1,32], index: 2, kind: input, shape index: {}]   ;;  %s2576_s3 = inlined_call_operand.vmem [shape: bf16[2,80,32], index: 3, kind: output, shape index: {}]  }
   0x1   :  { %s2059_s14 = smov 0  }
   0x2 LB: > { %s25_s15 = sadd.s32 1, %s2027_s13  ;;  %p1594_p0 = scmp.ge.s32.totalorder %s2031_s14, 1  ;;  %s2031_s14 = sphi %s2059_s14, %s13_s14   ;;  %s2027_s13 = sphi %s2057_s13, %s2578_s13   ;;  %s2023_s12 = sphi %s2055_s12, %s2577_s12  }
   0x3   : > { %p27_p1 = scmp.ge.s32.totalorder %s25_s15, 2  ;;  %p168_p2 = scmp.lt.s32.totalorder %s2031_s14, 3 }
   0x5   : > { %s2580_s15 = smov (%p27_p1, %s25_s15), 0  ;;  %p169_p3 = pnand %p1594_p0, %p168_p2 }
   0x6   : > { %v1986_v0 = vld [vmem:[%s2574_s1 + $0x8] sm:$0xff] (!%p169_p3)   ;;  %v2033_v1 = vmov (!%p169_p3), 0.0   ;;  %p202_p4 = scmp.lt.s32.totalorder (!%p169_p3), %s2023_s12, 1  ;;  %vm2034_vm0 = vmmov (!%p169_p3), 0   ;;  %vm270_vm1 = vsmask.f32 (!%p169_p3), 7424 }
   0x7   : > { %172 = sbr.rel (%p169_p3) target bundleno = 427 (0x1ab), region = 32  ;;  %1758 = vmatprep.subr.bf16.mxu0 (!%p169_p3), %v2033_v1  ;;  %1956 = vmatprep.subr.bf16.mxu1 (!%p169_p3), %v2033_v1  ;;  %vm321_vm2 = vcmask (!%p169_p3), 130048   ;;  %v1992_v30 = vld [vmem:[%s2574_s1 + $0x10] sm:$0xff] (!%p169_p3)   ;;  %v1993_v34 = vld [vmem:[%s2574_s1] sm:$0xff] (!%p169_p3)   ;;  %vm502_vm3 = vcmask (!%p169_p3), 1046528   ;;  %vm908_vm5 = vcmask (!%p169_p3), 1045504  }
   0x8   : > { %1759 = vmatpush3.bf16.msra.mxu0 (!%p169_p3), %v1986_v0  ;;  %1957 = vmatpush3.bf16.msra.mxu1 (!%p169_p3), %v1986_v0  ;;  %vm747_vm4 = vsmask.f32 (!%p169_p3), 6400  ;;  %vm1149_vm6 = vsmask.f32 (!%p169_p3), 5376  ;;  %vm1290_vm7 = vcmask (!%p169_p3), 1044480   ;;  %vm1472_vm8 = vcmask (!%p169_p3), 257024  }
   0x9   : > { %1760 = vmatprep.mubr.msk.bf16.mxu0 (!%p169_p3), %vm2034_vm0, %v2033_v1  ;;  %1772 = vmatprep.mubr.msk.bf16.mxu1 (!%p169_p3), %vm2034_vm0, %v2033_v1 }
   0xa   : > { %1802 = vmatprep.subr.bf16.mxu0 (!%p169_p3), %v2033_v1  ;;  %1780 = vmatprep.subr.bf16.mxu1 (!%p169_p3), %v2033_v1 }
   0xe   : > { %s2582_s12 = smov (!%p202_p4, %s2023_s12), 1 }
   0xf   : > { %s1958_s18 = smul.u32 56, %s2582_s12 }
  0x10   : > { %s1959_s17 = smul.u32 40, %s2582_s12 }
  0x11   : > { %s2090_s21 = scalar_lea.vmem %s2573_s0, %s1958_s18 }
  0x12   : > { %v224_v2 = vld [vmem:[%s2090_s21] sm:$0xf]  ;;  %v2094_v3 = vld [vmem:[%s2090_s21 + $0x4] sm:$0xf]  ;;  %v2097_v4 = vld [vmem:[%s2090_s21 + $0x8] sm:$0xf]  ;;  %s2529_s20 = scalar_lea.vmem %s2576_s3, %s1959_s17 }
  0x13   : > { %v2100_v5 = vld [vmem:[%s2090_s21 + $0xc] sm:$0xf]  ;;  %v2103_v6 = vcombine.low %v224_v2, %v2094_v3  ;;  %v230_v7 = vld [vmem:[%s2090_s21 + $0x18] sm:$0xf]  ;;  %v231_v8 = vld [vmem:[%s2090_s21 + $0x1c] sm:$0xf] }
  0x14   : > { %v2109_v9 = vcombine.low %v2097_v4, %v2100_v5  ;;  %v232_v10 = vld [vmem:[%s2090_s21 + $0x20] sm:$0xf]  ;;  %v233_v11 = vld [vmem:[%s2090_s21 + $0x24] sm:$0xf]  ;;  %v2113_v12 = vcombine.low %v230_v7, %v231_v8  ;;  %v2116_v13 = vld [vmem:[%s2090_s21 + $0x10] sm:$0xf] }
  0x15   : > { %v272_v14 = vshrl.u32 %v2103_v6, 16  ;;  %v274_v15 = vshll.u32 %v2103_v6, 16  ;;  %v2120_v16 = vcombine.low %v232_v10, %v233_v11  ;;  %v229_v17 = vld [vmem:[%s2090_s21 + $0x14] sm:$0xf]  ;;  %v234_v18 = vld [vmem:[%s2090_s21 + $0x28] sm:$0xf]  ;;  %v2171_v50 = vcombine.low %v231_v8, %v232_v10 }
  0x16   : > { %v279_v19 = vshll.u32 %v2109_v9, 16  ;;  %v295_v20 = vshll.u32 %v2113_v12, 16  ;;  %v299_v21 = vshrl.u32 %v2113_v12, 16  ;;  %v2128_v22 = vcombine.low %v2116_v13, %v229_v17  ;;  %v235_v37 = vld [vmem:[%s2090_s21 + $0x2c] sm:$0xf] }
  0x17   : > { %v276_v23 = vrot.slane %v274_v15, 1  ;;  %v303_v24 = vshll.u32 %v2120_v16, 16  ;;  %v2131_v25 = vcombine.low %v234_v18, %v234_v18  ;;  %v283_v31 = vshrl.u32 %v2109_v9, 16 }
  0x18   : > { %v281_v26 = vrot.slane %v279_v19, 1  ;;  %v297_v27 = vrot.slane %v295_v20, 1  ;;  %v287_v32 = vshll.u32 %v2128_v22, 16  ;;  %v307_v35 = vshrl.u32 %v2120_v16, 16 }
  0x19   : > { %v277_v28 = vor.u32 %v276_v23, %v272_v14  ;;  %v305_v29 = vrot.slane %v303_v24, 1  ;;  %v311_v38 = vshll.u32 %v2131_v25, 16  ;;  %v2151_v39 = vcombine.low %v233_v11, %v234_v18  ;;  %v1998_v23 = vld [vmem:[%s2574_s1 + $0x18] sm:$0xff]  }
  0x1a   : > { %v301_v33 = vor.u32 %v299_v21, %v297_v27  ;;  %v2155_v41 = vcombine.low %v234_v18, %v235_v37  ;;  %v285_v42 = vor.u32 %v283_v31, %v281_v26  ;;  %v289_v43 = vrot.slane %v287_v32, 1 }
  0x1b   : > { %v282_v36 = vsel %vm270_vm1, %v277_v28, %v281_v26  ;;  %v309_v44 = vor.u32 %v307_v35, %v305_v29  ;;  %v313_v45 = vrot.slane %v311_v38, 1  ;;  %v291_v47 = vshrl.u32 %v2128_v22, 16 }
  0x1c   : > { %1761 = vmatmul.mubr.msk.bf16.vlgmr.msra.gmra.mrb[0].mxu0 %vm321_vm2, %v282_v36  ;;  %v306_v40 = vsel %vm270_vm1, %v301_v33, %v305_v29  ;;  %v290_v46 = vsel %vm270_vm1, %v285_v42, %v289_v43  ;;  %v2168_v48 = vcombine.low %v229_v17, %v230_v7  ;;  %v2174_v52 = vrot.slane %v279_v19, 3 }
  0x1d   : > { %1773 = vmatmul.mubr.msk.bf16.vlgmr.msra.gmra.mrb[0].mxu1 %vm321_vm2, %v306_v40  ;;  %1803 = vmatpush3.bf16.msra.mxu0 %v1992_v30  ;;  %v314_v49 = vsel %vm270_vm1, %v309_v44, %v313_v45  ;;  %v634_v54 = vrot.slane %v2171_v50, 1  ;;  %v2179_v55 = vrot.slane %v283_v31, 2  ;;  %v293_v56 = vor.u32 %v291_v47, %v289_v43  ;;  %v2226_v45 = vld [vmem:[%s2090_s21 + $0x30] ss:$0 sps:$4 sm:$0xff]  }
  0x1e   : > { %1781 = vmatpush3.bf16.msra.mxu1 %v1993_v34  ;;  %1764 = vmatprep.mubr.msk.bf16.mxu0 %vm2034_vm0, %v2033_v1  ;;  %v766_v51 = vshrl.u32 %v2168_v48, 16  ;;  %v632_v53 = vrot.slane %v2168_v48, 1  ;;  %v769_v57 = vshll.u32 %v2168_v48, 16  ;;  %v636_v58 = vrot.slane %v2151_v39, 1 }
  0x1f   : > { %1776 = vmatprep.mubr.msk.bf16.mxu1 %vm2034_vm0, %v2033_v1  ;;  %1824 = vmatprep.subr.bf16.mxu1 %v2033_v1  ;;  %v1154_v59 = vrot.slane %v287_v32, 3  ;;  %v775_v62 = vshrl.u32 %v2171_v50, 16  ;;  %v778_v2 = vshll.u32 %v2171_v50, 16  ;;  %v1632_v7 = vcombine.low %v235_v37, %v235_v37 }
  0x20   : > { %1846 = vmatprep.subr.bf16.mxu0 %v2033_v1  ;;  %v2191_v60 = vsel %vm502_vm3, %v632_v53, %v634_v54  ;;  %v768_v61 = vrot.slane %v766_v51, 1  ;;  %v771_v63 = vrot.slane %v769_v57, 2  ;;  %v2195_v0 = vsel %vm502_vm3, %v634_v54, %v636_v58 }
  0x21   : > { %v503_v8 = vrot.slane %v2103_v6, 1  ;;  %v777_v10 = vrot.slane %v775_v62, 1  ;;  %v784_v11 = vshrl.u32 %v2151_v39, 16  ;;  %v787_v14 = vshll.u32 %v2151_v39, 16 }
  0x22   : > { %v298_v15 = vsel %vm270_vm1, %v293_v56, %v297_v27  ;;  %v780_v17 = vrot.slane %v778_v2, 2  ;;  %v638_v18 = vrot.slane %v1632_v7, 1  ;;  %v793_v19 = vshrl.u32 %v1632_v7, 16 }
  0x23   : > { %v504_v26 = vrot.slane %v2109_v9, 1  ;;  %v786_v28 = vrot.slane %v784_v11, 1  ;;  %v789_v29 = vrot.slane %v787_v14, 2  ;;  %v796_v30 = vshll.u32 %v1632_v7, 16 }
  0x24   : > { %1765 = vmatmul.mubr.msk.bf16.gmra.mrb[4].mxu0 %vm321_vm2, %v290_v46  ;;  %v2206_v31 = vor.u32 %v771_v63, %v768_v61  ;;  %v781_v32 = vor.u32 %v780_v17, %v777_v10  ;;  %v2209_v33 = vsel %vm502_vm3, %v636_v58, %v638_v18  ;;  %v795_v27 = vrot.slane %v793_v19, 1  ;;  %v1999_v63 = vld [vmem:[%s2574_s1 + $0x20] sm:$0xff]  }
  0x25   : > { %1777 = vmatmul.mubr.msk.bf16.gmra.mrb[4].mxu1 %vm321_vm2, %v314_v49  ;;  %1768 = vmatprep.mubr.msk.bf16.mxu0 %vm2034_vm0, %v2033_v1  ;;  %v506_v34 = vrot.slane %v2128_v22, 1  ;;  %v790_v36 = vor.u32 %v789_v29, %v786_v28  ;;  %v798_v37 = vrot.slane %v796_v30, 2  ;;  %v912_v38 = vrot.slane %v2168_v48, 2 }
  0x26   : > { %1782 = vmatprep.mubr.msk.bf16.mxu1 %vm2034_vm0, %v2033_v1  ;;  %v2220_v40 = vsel %vm747_vm4, %v2206_v31, %v781_v32  ;;  %v1031_v42 = vrot.slane %v2109_v9, 2  ;;  %v1032_v43 = vrot.slane %v2128_v22, 2  ;;  %v914_v44 = vrot.slane %v2171_v50, 2 }
  0x27   : > { %v1153_v46 = vrot.slane %v291_v47, 2  ;;  %v799_v49 = vor.u32 %v798_v37, %v795_v27  ;;  %v1034_v51 = vrot.slane %v2113_v12, 2  ;;  %v505_v54 = vsel %vm502_vm3, %v503_v8, %v504_v26 }
  0x28   : > { %v2239_v50 = vsel %vm908_vm5, %v1031_v42, %v1032_v43  ;;  %v2244_v47 = vsel %vm908_vm5, %v912_v38, %v914_v44  ;;  %v916_v56 = vrot.slane %v2151_v39, 2  ;;  %v1036_v61 = vrot.slane %v2120_v16, 2 }
  0x29   : > { %v2248_v57 = vsel %vm747_vm4, %v790_v36, %v799_v49  ;;  %v2251_v58 = vsel %vm908_vm5, %v1032_v43, %v1034_v51  ;;  %v918_v62 = vrot.slane %v1632_v7, 2  ;;  %v1038_v8 = vrot.slane %v2155_v41, 2 }
  0x2a   : > { %v2258_v2 = vsel %vm908_vm5, %v914_v44, %v916_v56  ;;  %v1040_v39 = vrot.slane %v2226_v45, 2  ;;  %v2263_v10 = vsel %vm908_vm5, %v1034_v51, %v1036_v61  ;;  %v1152_v7 = vor.u32 %v2174_v52, %v2179_v55 }
  0x2b   : > { %v2266_v11 = vsel %vm908_vm5, %v916_v56, %v918_v62  ;;  %v1155_v14 = vor.u32 %v1154_v59, %v1153_v46  ;;  %v1157_v18 = vrot.slane %v299_v21, 2  ;;  %v1158_v19 = vrot.slane %v295_v20, 3 }
  0x2c   : > { %1769 = vmatmul.mubr.msk.bf16.gmra.mrb[8].mxu0 %vm321_vm2, %v298_v15  ;;  %v2271_v15 = vsel %vm908_vm5, %v1036_v61, %v1038_v8  ;;  %v2274_v17 = vsel %vm908_vm5, %v1038_v8, %v1040_v39  ;;  %v1291_v52 = vrot.slane %v2109_v9, 3  ;;  %v1292_v55 = vrot.slane %v2128_v22, 3 }
  0x2d   : > { %1783 = vmatmul.mubr.msk.bf16.vlgmr.msra.gmra.mrb[8].mxu1 %vm321_vm2, %v2103_v6  ;;  %1804 = vmatprep.mubr.msk.bf16.mxu0 %vm2034_vm0, %v2033_v1  ;;  %v2231_v6 = vsel %vm747_vm4, %v781_v32, %v790_v36  ;;  %v1159_v59 = vor.u32 %v1158_v19, %v1157_v18  ;;  %v1161_v21 = vrot.slane %v307_v35, 2  ;;  %v1162_v20 = vrot.slane %v303_v24, 3 }
  0x2e   : > { %1825 = vmatpush3.bf16.msra.mxu1 %v1998_v23  ;;  %1786 = vmatprep.mubr.msk.bf16.mxu1 %vm2034_vm0, %v2033_v1  ;;  %v2282_v23 = vsel %vm1149_vm6, %v1152_v7, %v1155_v14  ;;  %v1294_v28 = vrot.slane %v2113_v12, 3  ;;  %v2298_v29 = vsel %vm1290_vm7, %v1291_v52, %v1292_v55  ;;  %v1166_v30 = vshrl.u32 %v2155_v41, 16 }
  0x2f   : > { %1868 = vmatprep.subr.bf16.mxu1 %v2033_v1  ;;  %v1169_v32 = vshll.u32 %v2155_v41, 16  ;;  %v2304_v35 = vsel %vm1149_vm6, %v1155_v14, %v1159_v59  ;;  %v1163_v24 = vor.u32 %v1162_v20, %v1161_v21  ;;  %v507_v42 = vsel %vm502_vm3, %v504_v26, %v506_v34 }
  0x30   : > { %v2307_v27 = vsel %vm1290_vm7, %v1292_v55, %v1294_v28  ;;  %v1168_v36 = vrot.slane %v1166_v30, 2  ;;  %v1296_v46 = vrot.slane %v2120_v16, 3  ;;  %v1175_v26 = vshrl.u32 %v2226_v45, 16 }
  0x31   : > { %v1171_v37 = vrot.slane %v1169_v32, 3  ;;  %v2315_v43 = vsel %vm1149_vm6, %v1159_v59, %v1163_v24  ;;  %v1298_v8 = vrot.slane %v2155_v41, 3  ;;  %v1627_v18 = vcombine.low %v2094_v3, %v2097_v4 }
  0x32   : > { %v2323_v51 = vsel %vm1290_vm7, %v1294_v28, %v1296_v46  ;;  %v1177_v56 = vrot.slane %v1175_v26, 2  ;;  %v512_v19 = vrot.slane %v2131_v25, 1  ;;  %v2001_v28 = vld [vmem:[%s2574_s1 + $0x28] sm:$0xff]  }
  0x33   : > { %v1172_v44 = vor.u32 %v1171_v37, %v1168_v36  ;;  %v2343_v7 = vsel %vm1290_vm7, %v1296_v46, %v1298_v8  ;;  %v752_v52 = vshll.u32 %v1627_v18, 16  ;;  %v629_v3 = vrot.slane %v1627_v18, 1  ;;  %v2003_v36 = vld [vmem:[%s2574_s1 + $0x30] sm:$0xff]  }
  0x34   : > { %1805 = vmatmul.mubr.msk.bf16.vlgmr.msra.gmra.mrb[12].mxu0 %vm321_vm2, %v505_v54  ;;  %v1178_v54 = vshll.u32 %v2226_v45, 16 }
  0x35   : > { %1787 = vmatmul.mubr.msk.bf16.gmra.mrb[12].mxu1 %vm321_vm2, %v2109_v9  ;;  %1847 = vmatpush3.bf16.msra.mxu0 %v1999_v63  ;;  %v2320_v49 = vsel %vm1149_vm6, %v1163_v24, %v1172_v44  ;;  %v508_v9 = vrot.slane %v2113_v12, 1  ;;  %v754_v21 = vrot.slane %v752_v52, 2 }
  0x36   : > { %1790 = vmatprep.mubr.msk.bf16.mxu1 %vm2034_vm0, %v2033_v1  ;;  %1808 = vmatprep.mubr.msk.bf16.mxu0 %vm2034_vm0, %v2033_v1  ;;  %v1180_v61 = vrot.slane %v1178_v54, 3 }
  0x37   : > { %1890 = vmatprep.subr.bf16.mxu0 %v2033_v1  ;;  %v509_v62 = vsel %vm502_vm3, %v506_v34, %v508_v9  ;;  %v1300_v34 = vrot.slane %v2226_v45, 3  ;;  %v749_v45 = vshrl.u32 %v1627_v18, 16 }
  0x38   : > { %v1181_v63 = vor.u32 %v1180_v61, %v1177_v56 }
  0x39   : > { %v2354_v41 = vsel %vm1290_vm7, %v1298_v8, %v1300_v34 }
  0x3a   : > { %v2340_v39 = vsel %vm1149_vm6, %v1172_v44, %v1181_v63 }
  0x3c   : > { %1809 = vmatmul.mubr.msk.bf16.gmra.mrb[16].mxu0 %vm321_vm2, %v507_v42 }
  0x3d   : > { %1791 = vmatmul.mubr.msk.bf16.gmra.mrb[16].mxu1 %vm321_vm2, %v2128_v22  ;;  %1812 = vmatprep.mubr.msk.bf16.mxu0 %vm2034_vm0, %v2033_v1  ;;  %v510_v22 = vrot.slane %v2120_v16, 1 }
  0x3e   : > { %1794 = vmatprep.mubr.msk.bf16.mxu1 %vm2034_vm0, %v2033_v1 }
  0x3f   : > { %v511_v14 = vsel %vm502_vm3, %v508_v9, %v510_v22 }
  0x44   : > { %1813 = vmatmul.mubr.msk.bf16.gmra.mrb[20].mxu0 %vm321_vm2, %v509_v62 }
  0x45   : > { %1795 = vmatmul.mubr.msk.bf16.gmra.mrb[20].mxu1 %vm321_vm2, %v2113_v12  ;;  %1816 = vmatprep.mubr.msk.bf16.mxu0 %vm2034_vm0, %v2033_v1  ;;  %v1628_v12 = vcombine.low %v2100_v5, %v2116_v13  ;;  %v513_v5 = vsel %vm502_vm3, %v510_v22, %v512_v19  ;;  %v751_v13 = vrot.slane %v749_v45, 1 }
  0x46   : > { %1798 = vmatprep.mubr.msk.bf16.mxu1 %vm2034_vm0, %v2033_v1 }
  0x47   : > { %v757_v55 = vshrl.u32 %v1628_v12, 16  ;;  %v760_v59 = vshll.u32 %v1628_v12, 16  ;;  %v630_v4 = vrot.slane %v1628_v12, 1  ;;  %v755_v30 = vor.u32 %v754_v21, %v751_v13 }
  0x49   : > { %v759_v25 = vrot.slane %v757_v55, 1  ;;  %v762_v20 = vrot.slane %v760_v59, 2  ;;  %v633_v37 = vsel %vm502_vm3, %v630_v4, %v632_v53  ;;  %v909_v53 = vrot.slane %v1627_v18, 2 }
  0x4b   : > { %v763_v32 = vor.u32 %v762_v20, %v759_v25 }
  0x4c   : > { %1817 = vmatmul.mubr.msk.bf16.gmra.mrb[24].mxu0 %vm321_vm2, %v511_v14 }
  0x4d   : > { %1799 = vmatmul.mubr.msk.bf16.gmra.mrb[24].mxu1 %vm321_vm2, %v2120_v16  ;;  %1820 = vmatprep.mubr.msk.bf16.mxu0 %vm2034_vm0, %v2033_v1  ;;  %v631_v16 = vsel %vm502_vm3, %v629_v3, %v630_v4  ;;  %v764_v24 = vsel %vm747_vm4, %v755_v30, %v763_v32  ;;  %v773_v42 = vsel %vm747_vm4, %v763_v32, %v2206_v31  ;;  %v2006_v31 = vld [vmem:[%s2574_s1 + $0x38] sm:$0xff]  }
  0x4e   : > { %1826 = vmatprep.mubr.msk.bf16.mxu1 %vm2034_vm0, %v2033_v1 }
  0x54   : > { %1821 = vmatmul.mubr.msk.bf16.gmra.mrb[28].mxu0 %vm321_vm2, %v513_v5 }
  0x55   : > { %1827 = vmatmul.mubr.msk.bf16.vlgmr.msra.gmra.mrb[28].mxu1 %vm321_vm2, %v631_v16  ;;  %1848 = vmatprep.mubr.msk.bf16.mxu0 %vm2034_vm0, %v2033_v1 }
  0x56   : > { %1869 = vmatpush3.bf16.msra.mxu1 %v2001_v28  ;;  %1830 = vmatprep.mubr.msk.bf16.mxu1 %vm2034_vm0, %v2033_v1 }
  0x57   : > { %1912 = vmatprep.subr.bf16.mxu1 %v2033_v1 }
  0x5c   : > { %1849 = vmatmul.mubr.msk.bf16.vlgmr.msra.gmra.mrb[32].mxu0 %vm321_vm2, %v764_v24 }
  0x5d   : > { %1831 = vmatmul.mubr.msk.bf16.gmra.mrb[32].mxu1 %vm321_vm2, %v633_v37  ;;  %1891 = vmatpush3.bf16.msra.mxu0 %v2003_v36 }
  0x5e   : > { %1834 = vmatprep.mubr.msk.bf16.mxu1 %vm2034_vm0, %v2033_v1  ;;  %1852 = vmatprep.mubr.msk.bf16.mxu0 %vm2034_vm0, %v2033_v1 }
  0x5f   : > { %1934 = vmatprep.subr.bf16.mxu0 %v2033_v1 }
  0x64   : > { %1853 = vmatmul.mubr.msk.bf16.gmra.mrb[36].mxu0 %vm321_vm2, %v773_v42 }
  0x65   : > { %1835 = vmatmul.mubr.msk.bf16.gmra.mrb[36].mxu1 %vm321_vm2, %v2191_v60  ;;  %1856 = vmatprep.mubr.msk.bf16.mxu0 %vm2034_vm0, %v2033_v1  ;;  %v910_v60 = vrot.slane %v1628_v12, 2 }
  0x66   : > { %1838 = vmatprep.mubr.msk.bf16.mxu1 %vm2034_vm0, %v2033_v1 }
  0x6c   : > { %1857 = vmatmul.mubr.msk.bf16.gmra.mrb[40].mxu0 %vm321_vm2, %v2220_v40  ;;  %v913_v40 = vsel %vm908_vm5, %v910_v60, %v912_v38 }
  0x6d   : > { %1839 = vmatmul.mubr.msk.bf16.gmra.mrb[40].mxu1 %vm321_vm2, %v2195_v0  ;;  %1860 = vmatprep.mubr.msk.bf16.mxu0 %vm2034_vm0, %v2033_v1  ;;  %v911_v0 = vsel %vm908_vm5, %v909_v53, %v910_v60 }
  0x6e   : > { %1842 = vmatprep.mubr.msk.bf16.mxu1 %vm2034_vm0, %v2033_v1 }
  0x74   : > { %1861 = vmatmul.mubr.msk.bf16.gmra.mrb[44].mxu0 %vm321_vm2, %v2231_v6 }
  0x75   : > { %1843 = vmatmul.mubr.msk.bf16.gmra.mrb[44].mxu1 %vm321_vm2, %v2209_v33  ;;  %1864 = vmatprep.mubr.msk.bf16.mxu0 %vm2034_vm0, %v2033_v1  ;;  %v2007_v33 = vld [vmem:[%s2574_s1 + $0x40] sm:$0xff]  }
  0x76   : > { %1870 = vmatprep.mubr.msk.bf16.mxu1 %vm2034_vm0, %v2033_v1 }
  0x7c   : > { %1865 = vmatmul.mubr.msk.bf16.gmra.mrb[48].mxu0 %vm321_vm2, %v2248_v57 }
  0x7d   : > { %1871 = vmatmul.mubr.msk.bf16.vlgmr.msra.gmra.mrb[48].mxu1 %vm321_vm2, %v911_v0  ;;  %1892 = vmatprep.mubr.msk.bf16.mxu0 %vm2034_vm0, %v2033_v1 }
  0x7e   : > { %1913 = vmatpush3.bf16.msra.mxu1 %v2006_v31  ;;  %1874 = vmatprep.mubr.msk.bf16.mxu1 %vm2034_vm0, %v2033_v1 }
  0x84   : > { %1893 = vmatmul.mubr.msk.bf16.vlgmr.msra.gmra.mrb[52].mxu0 %vm321_vm2, %v2239_v50 }
  0x85   : > { %1875 = vmatmul.mubr.msk.bf16.gmra.mrb[52].mxu1 %vm321_vm2, %v913_v40  ;;  %1935 = vmatpush3.bf16.msra.mxu0 %v2007_v33 }
  0x86   : > { %1878 = vmatprep.mubr.msk.bf16.mxu1 %vm2034_vm0, %v2033_v1  ;;  %1896 = vmatprep.mubr.msk.bf16.mxu0 %vm2034_vm0, %v2033_v1 }
  0x8c   : > { %1897 = vmatmul.mubr.msk.bf16.gmra.mrb[56].mxu0 %vm321_vm2, %v2251_v58 }
  0x8d   : > { %1879 = vmatmul.mubr.msk.bf16.gmra.mrb[56].mxu1 %vm321_vm2, %v2244_v47  ;;  %1900 = vmatprep.mubr.msk.bf16.mxu0 %vm2034_vm0, %v2033_v1 }
  0x8e   : > { %1882 = vmatprep.mubr.msk.bf16.mxu1 %vm2034_vm0, %v2033_v1 }
  0x94   : > { %1901 = vmatmul.mubr.msk.bf16.gmra.mrb[60].mxu0 %vm321_vm2, %v2263_v10 }
  0x95   : > { %1883 = vmatmul.mubr.msk.bf16.gmra.mrb[60].mxu1 %vm321_vm2, %v2258_v2  ;;  %1904 = vmatprep.mubr.msk.bf16.mxu0 %vm2034_vm0, %v2033_v1 }
  0x96   : > { %1886 = vmatprep.mubr.msk.bf16.mxu1 %vm2034_vm0, %v2033_v1 }
  0x9c   : > { %1905 = vmatmul.mubr.msk.bf16.gmra.mrb[64].mxu0 %vm321_vm2, %v2271_v15 }
  0x9d   : > { %1887 = vmatmul.mubr.msk.bf16.gmra.mrb[64].mxu1 %vm321_vm2, %v2266_v11  ;;  %1908 = vmatprep.mubr.msk.bf16.mxu0 %vm2034_vm0, %v2033_v1 }
  0x9e   : > { %1914 = vmatprep.mubr.msk.bf16.mxu1 %vm2034_vm0, %v2033_v1 }
  0xa4   : > { %1909 = vmatmul.mubr.msk.bf16.gmra.mrb[68].mxu0 %vm321_vm2, %v2274_v17 }
  0xa5   : > { %1915 = vmatmul.mubr.msk.bf16.vlgmr.msra.gmra.mrb[68].mxu1 %vm321_vm2, %v2282_v23  ;;  %1936 = vmatprep.mubr.msk.bf16.mxu0 %vm2034_vm0, %v2033_v1 }
  0xa6   : > { %1918 = vmatprep.mubr.msk.bf16.mxu1 %vm2034_vm0, %v2033_v1 }
  0xac   : > { %1937 = vmatmul.mubr.msk.bf16.vlgmr.msra.gmra.mrb[72].mxu0 %vm321_vm2, %v2298_v29 }
  0xad   : > { %1919 = vmatmul.mubr.msk.bf16.gmra.mrb[72].mxu1 %vm321_vm2, %v2304_v35  ;;  %1940 = vmatprep.mubr.msk.bf16.mxu0 %vm2034_vm0, %v2033_v1 }
  0xae   : > { %1922 = vmatprep.mubr.msk.bf16.mxu1 %vm2034_vm0, %v2033_v1 }
  0xb4   : > { %1941 = vmatmul.mubr.msk.bf16.gmra.mrb[76].mxu0 %vm321_vm2, %v2307_v27 }
  0xb5   : > { %1923 = vmatmul.mubr.msk.bf16.gmra.mrb[76].mxu1 %vm321_vm2, %v2315_v43  ;;  %1944 = vmatprep.mubr.msk.bf16.mxu0 %vm2034_vm0, %v2033_v1 }
  0xb6   : > { %1926 = vmatprep.mubr.msk.bf16.mxu1 %vm2034_vm0, %v2033_v1 }
  0xbc   : > { %1945 = vmatmul.mubr.msk.bf16.gmra.mrb[80].mxu0 %vm321_vm2, %v2323_v51 }
  0xbd   : > { %1927 = vmatmul.mubr.msk.bf16.gmra.mrb[80].mxu1 %vm321_vm2, %v2320_v49  ;;  %1948 = vmatprep.mubr.msk.bf16.mxu0 %vm2034_vm0, %v2033_v1 }
  0xbe   : > { %1930 = vmatprep.mubr.msk.bf16.mxu1 %vm2034_vm0, %v2033_v1 }
  0xc4   : > { %1949 = vmatmul.mubr.msk.bf16.gmra.mrb[84].mxu0 %vm321_vm2, %v2343_v7 }
  0xc5   : > { %1931 = vmatmul.mubr.msk.bf16.gmra.mrb[84].mxu1 %vm321_vm2, %v2340_v39  ;;  %1952 = vmatprep.mubr.msk.bf16.mxu0 %vm2034_vm0, %v2033_v1 }
  0xcc   : > { %1953 = vmatmul.mubr.msk.bf16.gmra.mrb[88].mxu0 %vm321_vm2, %v2354_v41 }
  0xef   : > { %v371_v48 = vpop.f32.mrb[0].mxu0 }
  0xf0   : > { %v1762_v38 = vpop.f32.mrb[1].mxu0  ;;  %v395_v6 = vpop.f32.mrb[0].mxu1 }
  0xf1   : > { %v374_v50 = vpop.f32.mrb[2].mxu0  ;;  %v1774_v47 = vpop.f32.mrb[1].mxu1 }
  0xf2   : > { %v1763_v57 = vpop.f32.mrb[3].mxu0  ;;  %v398_v58 = vpop.f32.mrb[2].mxu1 }
  0xf3   : > { %v1775_v2 = vpop.f32.mrb[3].mxu1 }
  0xf7   : > { %v379_v10 = vpop.f32.mrb[4].mxu0 }
  0xf8   : > { %v1766_v11 = vpop.f32.mrb[5].mxu0  ;;  %v403_v15 = vpop.f32.mrb[4].mxu1 }
  0xf9   : > { %v382_v17 = vpop.f32.mrb[6].mxu0  ;;  %v1778_v23 = vpop.f32.mrb[5].mxu1 }
  0xfa   : > { %v1767_v29 = vpop.f32.mrb[7].mxu0  ;;  %v406_v35 = vpop.f32.mrb[6].mxu1 }
  0xfb   : > { %v1779_v27 = vpop.f32.mrb[7].mxu1 }
  0xff   : > { %v387_v1 = vpop.f32.mrb[8].mxu0 }
 0x100   : > { %v460_v43 = vpop.f32.mrb[8].mxu1  ;;  %v1770_v44 = vpop.f32.mrb[9].mxu0 }
 0x101   : > { %v461_v46 = vadd.f32 %v460_v43, %v371_v48  ;;  %v1784_v49 = vpop.f32.mrb[9].mxu1  ;;  %v390_v51 = vpop.f32.mrb[10].mxu0 }
 0x102   : > { %v463_v9 = vpop.f32.mrb[10].mxu1  ;;  %v1771_v26 = vpop.f32.mrb[11].mxu0 }
 0x103   : > { %v464_v54 = vadd.f32 %v463_v9, %v374_v50  ;;  %v1785_v56 = vpop.f32.mrb[11].mxu1 }
 0x107   : > { %v569_v61 = vpop.f32.mrb[12].mxu0 }
 0x108   : > { %v468_v62 = vpop.f32.mrb[12].mxu1  ;;  %v608_v63 = vadd.f32 %v569_v61, %v461_v46  ;;  %v1806_v8 = vpop.f32.mrb[13].mxu0 }
 0x109   : > { %v469_v39 = vadd.f32 %v468_v62, %v379_v10  ;;  %v1788_v7 = vpop.f32.mrb[13].mxu1  ;;  %v572_v22 = vpop.f32.mrb[14].mxu0 }
 0x10a   : > { %v471_v34 = vpop.f32.mrb[14].mxu1  ;;  %v609_v41 = vadd.f32 %v572_v22, %v464_v54  ;;  %v1807_v14 = vpop.f32.mrb[15].mxu0 }
 0x10b   : > { %v472_v18 = vadd.f32 %v471_v34, %v382_v17  ;;  %v1789_v12 = vpop.f32.mrb[15].mxu1 }
 0x10f   : > { %v577_v19 = vpop.f32.mrb[16].mxu0 }
 0x110   : > { %v476_v45 = vpop.f32.mrb[16].mxu1  ;;  %v610_v52 = vadd.f32 %v577_v19, %v469_v39  ;;  %v1810_v55 = vpop.f32.mrb[17].mxu0 }
 0x111   : > { %v477_v59 = vadd.f32 %v476_v45, %v387_v1  ;;  %v1792_v3 = vpop.f32.mrb[17].mxu1  ;;  %v580_v4 = vpop.f32.mrb[18].mxu0 }
 0x112   : > { %v479_v5 = vpop.f32.mrb[18].mxu1  ;;  %v611_v13 = vadd.f32 %v580_v4, %v472_v18  ;;  %v1811_v21 = vpop.f32.mrb[19].mxu0 }
 0x113   : > { %v480_v25 = vadd.f32 %v479_v5, %v390_v51  ;;  %v1793_v20 = vpop.f32.mrb[19].mxu1 }
 0x117   : > { %v585_v16 = vpop.f32.mrb[20].mxu0 }
 0x118   : > { %v484_v28 = vpop.f32.mrb[20].mxu1  ;;  %v612_v30 = vadd.f32 %v585_v16, %v477_v59  ;;  %v1814_v32 = vpop.f32.mrb[21].mxu0 }
 0x119   : > { %v485_v24 = vadd.f32 %v484_v28, %v395_v6  ;;  %v1796_v36 = vpop.f32.mrb[21].mxu1  ;;  %v588_v37 = vpop.f32.mrb[22].mxu0 }
 0x11a   : > { %v487_v42 = vpop.f32.mrb[22].mxu1  ;;  %v613_v53 = vadd.f32 %v588_v37, %v480_v25  ;;  %v1815_v60 = vpop.f32.mrb[23].mxu0 }
 0x11b   : > { %v488_v0 = vadd.f32 %v487_v42, %v398_v58  ;;  %v1797_v31 = vpop.f32.mrb[23].mxu1 }
 0x11f   : > { %v593_v33 = vpop.f32.mrb[24].mxu0 }
 0x120   : > { %v492_v40 = vpop.f32.mrb[24].mxu1  ;;  %v614_v48 = vadd.f32 %v593_v33, %v485_v24  ;;  %v1818_v38 = vpop.f32.mrb[25].mxu0 }
 0x121   : > { %v493_v50 = vadd.f32 %v492_v40, %v403_v15  ;;  %v1800_v47 = vpop.f32.mrb[25].mxu1  ;;  %v596_v57 = vpop.f32.mrb[26].mxu0 }
 0x122   : > { %v495_v2 = vpop.f32.mrb[26].mxu1  ;;  %v615_v10 = vadd.f32 %v596_v57, %v488_v0  ;;  %v1819_v11 = vpop.f32.mrb[27].mxu0 }
 0x123   : > { %v496_v17 = vadd.f32 %v495_v2, %v406_v35  ;;  %v1801_v23 = vpop.f32.mrb[27].mxu1 }
 0x127   : > { %v601_v6 = vpop.f32.mrb[28].mxu0 }
 0x128   : > { %v616_v29 = vadd.f32 %v601_v6, %v493_v50  ;;  %v695_v27 = vpop.f32.mrb[28].mxu1  ;;  %v1822_v1 = vpop.f32.mrb[29].mxu0 }
 0x129   : > { %v734_v43 = vadd.f32 %v695_v27, %v608_v63  ;;  %v1828_v44 = vpop.f32.mrb[29].mxu1  ;;  %v604_v58 = vpop.f32.mrb[30].mxu0 }
 0x12a   : > { %v617_v46 = vadd.f32 %v604_v58, %v496_v17  ;;  %v698_v49 = vpop.f32.mrb[30].mxu1  ;;  %v1823_v51 = vpop.f32.mrb[31].mxu0 }
 0x12b   : > { %v735_v9 = vadd.f32 %v698_v49, %v609_v41  ;;  %v1829_v26 = vpop.f32.mrb[31].mxu1 }
 0x12f   : > { %v856_v15 = vpop.f32.mrb[32].mxu0 }
 0x130   : > { %v703_v54 = vpop.f32.mrb[32].mxu1  ;;  %v895_v56 = vadd.f32 %v856_v15, %v734_v43  ;;  %v1850_v61 = vpop.f32.mrb[33].mxu0 }
 0x131   : > { %v736_v62 = vadd.f32 %v703_v54, %v610_v52  ;;  %v1832_v8 = vpop.f32.mrb[33].mxu1  ;;  %v859_v35 = vpop.f32.mrb[34].mxu0 }
 0x132   : > { %v706_v39 = vpop.f32.mrb[34].mxu1  ;;  %v896_v7 = vadd.f32 %v859_v35, %v735_v9  ;;  %v1851_v22 = vpop.f32.mrb[35].mxu0 }
 0x133   : > { %v737_v34 = vadd.f32 %v706_v39, %v611_v13  ;;  %v1833_v14 = vpop.f32.mrb[35].mxu1 }
 0x137   : > { %v864_v63 = vpop.f32.mrb[36].mxu0 }
 0x138   : > { %v711_v18 = vpop.f32.mrb[36].mxu1  ;;  %v897_v12 = vadd.f32 %v864_v63, %v736_v62  ;;  %v1854_v19 = vpop.f32.mrb[37].mxu0 }
 0x139   : > { %v738_v45 = vadd.f32 %v711_v18, %v612_v30  ;;  %v1836_v55 = vpop.f32.mrb[37].mxu1  ;;  %v867_v41 = vpop.f32.mrb[38].mxu0 }
 0x13a   : > { %v714_v59 = vpop.f32.mrb[38].mxu1  ;;  %v898_v3 = vadd.f32 %v867_v41, %v737_v34  ;;  %v1855_v4 = vpop.f32.mrb[39].mxu0 }
 0x13b   : > { %v739_v5 = vadd.f32 %v714_v59, %v613_v53  ;;  %v1837_v21 = vpop.f32.mrb[39].mxu1 }
 0x13f   : > { %v872_v52 = vpop.f32.mrb[40].mxu0 }
 0x140   : > { %v719_v25 = vpop.f32.mrb[40].mxu1  ;;  %v899_v20 = vadd.f32 %v872_v52, %v738_v45  ;;  %v1858_v16 = vpop.f32.mrb[41].mxu0 }
 0x141   : > { %v740_v28 = vadd.f32 %v719_v25, %v614_v48  ;;  %v1840_v32 = vpop.f32.mrb[41].mxu1  ;;  %v875_v13 = vpop.f32.mrb[42].mxu0 }
 0x142   : > { %v722_v24 = vpop.f32.mrb[42].mxu1  ;;  %v900_v36 = vadd.f32 %v875_v13, %v739_v5  ;;  %v1859_v37 = vpop.f32.mrb[43].mxu0 }
 0x143   : > { %v741_v42 = vadd.f32 %v722_v24, %v615_v10  ;;  %v1841_v60 = vpop.f32.mrb[43].mxu1 }
 0x147   : > { %v880_v30 = vpop.f32.mrb[44].mxu0 }
 0x148   : > { %v727_v0 = vpop.f32.mrb[44].mxu1  ;;  %v901_v31 = vadd.f32 %v880_v30, %v740_v28  ;;  %v1862_v33 = vpop.f32.mrb[45].mxu0 }
 0x149   : > { %v742_v40 = vadd.f32 %v727_v0, %v616_v29  ;;  %v1844_v38 = vpop.f32.mrb[45].mxu1  ;;  %v883_v53 = vpop.f32.mrb[46].mxu0 }
 0x14a   : > { %v730_v50 = vpop.f32.mrb[46].mxu1  ;;  %v902_v47 = vadd.f32 %v883_v53, %v741_v42  ;;  %v1863_v57 = vpop.f32.mrb[47].mxu0 }
 0x14b   : > { %v743_v2 = vadd.f32 %v730_v50, %v617_v46  ;;  %v1845_v11 = vpop.f32.mrb[47].mxu1 }
 0x14f   : > { %v888_v48 = vpop.f32.mrb[48].mxu0 }
 0x150   : > { %v903_v17 = vadd.f32 %v888_v48, %v742_v40  ;;  %v975_v23 = vpop.f32.mrb[48].mxu1  ;;  %v1866_v6 = vpop.f32.mrb[49].mxu0 }
 0x151   : > { %v1014_v27 = vadd.f32 %v975_v23, %v895_v56  ;;  %v1872_v1 = vpop.f32.mrb[49].mxu1  ;;  %v891_v10 = vpop.f32.mrb[50].mxu0 }
 0x152   : > { %v904_v43 = vadd.f32 %v891_v10, %v743_v2  ;;  %v978_v44 = vpop.f32.mrb[50].mxu1  ;;  %v1867_v58 = vpop.f32.mrb[51].mxu0 }
 0x153   : > { %v1015_v49 = vadd.f32 %v978_v44, %v896_v7  ;;  %v1873_v51 = vpop.f32.mrb[51].mxu1 }
 0x157   : > { %v1097_v29 = vpop.f32.mrb[52].mxu0 }
 0x158   : > { %v983_v9 = vpop.f32.mrb[52].mxu1  ;;  %v1136_v26 = vadd.f32 %v1097_v29, %v1014_v27  ;;  %v1894_v15 = vpop.f32.mrb[53].mxu0 }
 0x159   : > { %v1016_v54 = vadd.f32 %v983_v9, %v897_v12  ;;  %v1876_v61 = vpop.f32.mrb[53].mxu1  ;;  %v1100_v46 = vpop.f32.mrb[54].mxu0 }
 0x15a   : > { %v986_v62 = vpop.f32.mrb[54].mxu1  ;;  %v1137_v8 = vadd.f32 %v1100_v46, %v1015_v49  ;;  %v1895_v35 = vpop.f32.mrb[55].mxu0 }
 0x15b   : > { %v1017_v39 = vadd.f32 %v986_v62, %v898_v3  ;;  %v1877_v22 = vpop.f32.mrb[55].mxu1 }
 0x15f   : > { %v1105_v56 = vpop.f32.mrb[56].mxu0 }
 0x160   : > { %v991_v34 = vpop.f32.mrb[56].mxu1  ;;  %v1138_v14 = vadd.f32 %v1105_v56, %v1016_v54  ;;  %v1898_v63 = vpop.f32.mrb[57].mxu0 }
 0x161   : > { %v1018_v18 = vadd.f32 %v991_v34, %v899_v20  ;;  %v1880_v19 = vpop.f32.mrb[57].mxu1  ;;  %v1108_v7 = vpop.f32.mrb[58].mxu0 }
 0x162   : > { %v994_v45 = vpop.f32.mrb[58].mxu1  ;;  %v1139_v55 = vadd.f32 %v1108_v7, %v1017_v39  ;;  %v1899_v41 = vpop.f32.mrb[59].mxu0 }
 0x163   : > { %v1019_v59 = vadd.f32 %v994_v45, %v900_v36  ;;  %v1881_v4 = vpop.f32.mrb[59].mxu1 }
 0x167   : > { %v1113_v12 = vpop.f32.mrb[60].mxu0 }
 0x168   : > { %v999_v5 = vpop.f32.mrb[60].mxu1  ;;  %v1140_v21 = vadd.f32 %v1113_v12, %v1018_v18  ;;  %v1902_v52 = vpop.f32.mrb[61].mxu0 }
 0x169   : > { %v1020_v25 = vadd.f32 %v999_v5, %v901_v31  ;;  %v1884_v16 = vpop.f32.mrb[61].mxu1  ;;  %v1116_v3 = vpop.f32.mrb[62].mxu0 }
 0x16a   : > { %v1002_v28 = vpop.f32.mrb[62].mxu1  ;;  %v2508_v32 = vadd.f32 %v1116_v3, %v1019_v59  ;;  %v1903_v13 = vpop.f32.mrb[63].mxu0 }
 0x16b   : > { %v1021_v24 = vadd.f32 %v1002_v28, %v902_v47  ;;  %v1885_v20 = vpop.f32.mrb[63].mxu1 }
 0x16f   : > { %v1121_v37 = vpop.f32.mrb[64].mxu0 }
 0x170   : > { %v1007_v42 = vpop.f32.mrb[64].mxu1  ;;  %v2510_v60 = vadd.f32 %v1121_v37, %v1020_v25  ;;  %v1906_v30 = vpop.f32.mrb[65].mxu0 }
 0x171   : > { %v1022_v36 = vadd.f32 %v1007_v42, %v903_v17  ;;  %v1888_v0 = vpop.f32.mrb[65].mxu1  ;;  %v1124_v33 = vpop.f32.mrb[66].mxu0 }
 0x172   : > { %v1010_v40 = vpop.f32.mrb[66].mxu1  ;;  %v2512_v38 = vadd.f32 %v1124_v33, %v1021_v24  ;;  %v1907_v31 = vpop.f32.mrb[67].mxu0 }
 0x173   : > { %v1023_v53 = vadd.f32 %v1010_v40, %v904_v43  ;;  %v1889_v50 = vpop.f32.mrb[67].mxu1  ;;  %v2521_v43 = vld [vmem:[%s2575_s2] ss:$0 sm:$0xff] }
 0x177   : > { %v1129_v57 = vpop.f32.mrb[68].mxu0 }
 0x178   : > { %v2514_v2 = vadd.f32 %v1129_v57, %v1022_v36  ;;  %v1238_v11 = vpop.f32.mrb[68].mxu1  ;;  %v1910_v47 = vpop.f32.mrb[69].mxu0 }
 0x179   : > { %v1277_v48 = vadd.f32 %v1238_v11, %v1136_v26  ;;  %v1916_v23 = vpop.f32.mrb[69].mxu1  ;;  %v1132_v6 = vpop.f32.mrb[70].mxu0 }
 0x17a   : > { %v2516_v27 = vadd.f32 %v1132_v6, %v1023_v53  ;;  %v1241_v17 = vpop.f32.mrb[70].mxu1  ;;  %v1911_v1 = vpop.f32.mrb[71].mxu0 }
 0x17b   : > { %v1278_v10 = vadd.f32 %v1241_v17, %v1137_v8  ;;  %v1917_v44 = vpop.f32.mrb[71].mxu1 }
 0x17f   : > { %v1357_v58 = vpop.f32.mrb[72].mxu0 }
 0x180   : > { %v1246_v49 = vpop.f32.mrb[72].mxu1  ;;  %v1396_v51 = vadd.f32 %v1357_v58, %v1277_v48  ;;  %v1938_v29 = vpop.f32.mrb[73].mxu0 }
 0x181   : > { %v1279_v9 = vadd.f32 %v1246_v49, %v1138_v14  ;;  %v1920_v26 = vpop.f32.mrb[73].mxu1  ;;  %v1360_v15 = vpop.f32.mrb[74].mxu0 }
 0x182   : > { %v1412_v54 = vadd.f32 %v2521_v43, %v1396_v51  ;;  %v1249_v61 = vpop.f32.mrb[74].mxu1  ;;  %v1397_v46 = vadd.f32 %v1360_v15, %v1278_v10  ;;  %v1939_v62 = vpop.f32.mrb[75].mxu0 }
 0x183   : > { %v1280_v8 = vadd.f32 %v1249_v61, %v1139_v55  ;;  %v1921_v35 = vpop.f32.mrb[75].mxu1 }
 0x184   : > { %v1422_v39 = vmax.f32 %v1412_v54, 0.0  ;;  %v1413_v22 = vadd.f32 %v2521_v43, %v1397_v46 }
 0x186   : > { %v1694_v56 = vpack.c.bf16 %v1422_v39, %v1422_v39  ;;  %v1423_v34 = vmax.f32 %v1413_v22, 0.0 }
 0x187   : > { %v1365_v14 = vpop.f32.mrb[76].mxu0 }
 0x188   : > { %1473 = vst.msk [vmem:[%s2529_s20] sm:$0xf] %vm1472_vm8, %v1694_v56  ;;  %v1695_v63 = vpack.c.bf16 %v1423_v34, %v1423_v34  ;;  %v1254_v18 = vpop.f32.mrb[76].mxu1  ;;  %v1398_v19 = vadd.f32 %v1365_v14, %v1279_v9  ;;  %v1942_v7 = vpop.f32.mrb[77].mxu0 }
 0x189   : > { %v1281_v45 = vadd.f32 %v1254_v18, %v1140_v21  ;;  %v1924_v55 = vpop.f32.mrb[77].mxu1  ;;  %v1368_v41 = vpop.f32.mrb[78].mxu0 }
 0x18a   : > { %1474 = vst.msk [vmem:[%s2529_s20 + $0x4] sm:$0xf] %vm1472_vm8, %v1695_v63  ;;  %v1414_v59 = vadd.f32 %v2521_v43, %v1398_v19  ;;  %v1257_v4 = vpop.f32.mrb[78].mxu1  ;;  %v1399_v12 = vadd.f32 %v1368_v41, %v1280_v8  ;;  %v1943_v5 = vpop.f32.mrb[79].mxu0 }
 0x18b   : > { %v1282_v52 = vadd.f32 %v1257_v4, %v2508_v32  ;;  %v1925_v25 = vpop.f32.mrb[79].mxu1 }
 0x18c   : > { %v1424_v16 = vmax.f32 %v1414_v59, 0.0  ;;  %v1415_v3 = vadd.f32 %v2521_v43, %v1399_v12 }
 0x18e   : > { %v1696_v28 = vpack.c.bf16 %v1424_v16, %v1424_v16  ;;  %v1425_v13 = vmax.f32 %v1415_v3, 0.0 }
 0x18f   : > { %v1373_v24 = vpop.f32.mrb[80].mxu0 }
 0x190   : > { %1475 = vst.msk [vmem:[%s2529_s20 + $0x8] sm:$0xf] %vm1472_vm8, %v1696_v28  ;;  %v1697_v21 = vpack.c.bf16 %v1425_v13, %v1425_v13  ;;  %v1262_v20 = vpop.f32.mrb[80].mxu1  ;;  %v1400_v37 = vadd.f32 %v1373_v24, %v1281_v45  ;;  %v1946_v42 = vpop.f32.mrb[81].mxu0 }
 0x191   : > { %v1283_v30 = vadd.f32 %v1262_v20, %v2510_v60  ;;  %v1928_v36 = vpop.f32.mrb[81].mxu1  ;;  %v1376_v0 = vpop.f32.mrb[82].mxu0 }
 0x192   : > { %1476 = vst.msk [vmem:[%s2529_s20 + $0xc] sm:$0xf] %vm1472_vm8, %v1697_v21  ;;  %v1416_v32 = vadd.f32 %v2521_v43, %v1400_v37  ;;  %v1265_v33 = vpop.f32.mrb[82].mxu1  ;;  %v1401_v40 = vadd.f32 %v1376_v0, %v1282_v52  ;;  %v1947_v31 = vpop.f32.mrb[83].mxu0 }
 0x193   : > { %v1284_v53 = vadd.f32 %v1265_v33, %v2512_v38  ;;  %v1929_v50 = vpop.f32.mrb[83].mxu1 }
 0x194   : > { %v1426_v57 = vmax.f32 %v1416_v32, 0.0  ;;  %v1417_v11 = vadd.f32 %v2521_v43, %v1401_v40 }
 0x196   : > { %v1698_v47 = vpack.c.bf16 %v1426_v57, %v1426_v57  ;;  %v1427_v48 = vmax.f32 %v1417_v11, 0.0 }
 0x197   : > { %v1381_v23 = vpop.f32.mrb[84].mxu0 }
 0x198   : > { %1477 = vst.msk [vmem:[%s2529_s20 + $0x10] sm:$0xf] %vm1472_vm8, %v1698_v47  ;;  %v1699_v60 = vpack.c.bf16 %v1427_v48, %v1427_v48  ;;  %v1270_v6 = vpop.f32.mrb[84].mxu1  ;;  %v1402_v17 = vadd.f32 %v1381_v23, %v1283_v30  ;;  %v1950_v1 = vpop.f32.mrb[85].mxu0 }
 0x199   : > { %v1285_v10 = vadd.f32 %v1270_v6, %v2514_v2  ;;  %v1932_v44 = vpop.f32.mrb[85].mxu1  ;;  %v1384_v58 = vpop.f32.mrb[86].mxu0 }
 0x19a   : > { %1478 = vst.msk [vmem:[%s2529_s20 + $0x14] sm:$0xf] %vm1472_vm8, %v1699_v60  ;;  %v1418_v38 = vadd.f32 %v2521_v43, %v1402_v17  ;;  %v1273_v49 = vpop.f32.mrb[86].mxu1  ;;  %v1403_v51 = vadd.f32 %v1384_v58, %v1284_v53  ;;  %v1951_v29 = vpop.f32.mrb[87].mxu0 }
 0x19b   : > { %v1286_v9 = vadd.f32 %v1273_v49, %v2516_v27  ;;  %v1933_v26 = vpop.f32.mrb[87].mxu1 }
 0x19c   : > { %v1428_v15 = vmax.f32 %v1418_v38, 0.0  ;;  %v1419_v54 = vadd.f32 %v2521_v43, %v1403_v51 }
 0x19e   : > { %v1700_v61 = vpack.c.bf16 %v1428_v15, %v1428_v15  ;;  %v1429_v46 = vmax.f32 %v1419_v54, 0.0 }
 0x19f   : > { %v1389_v2 = vpop.f32.mrb[88].mxu0 }
 0x1a0   : > { %1479 = vst.msk [vmem:[%s2529_s20 + $0x18] sm:$0xf] %vm1472_vm8, %v1700_v61  ;;  %v1701_v62 = vpack.c.bf16 %v1429_v46, %v1429_v46  ;;  %v1404_v8 = vadd.f32 %v1389_v2, %v1285_v10  ;;  %v1954_v35 = vpop.f32.mrb[89].mxu0 }
 0x1a1   : > { %v1392_v39 = vpop.f32.mrb[90].mxu0 }
 0x1a2   : > { %1480 = vst.msk [vmem:[%s2529_s20 + $0x1c] sm:$0xf] %vm1472_vm8, %v1701_v62  ;;  %v1420_v22 = vadd.f32 %v2521_v43, %v1404_v8  ;;  %v1405_v27 = vadd.f32 %v1392_v39, %v1286_v9  ;;  %v1955_v56 = vpop.f32.mrb[91].mxu0 }
 0x1a4   : > { %v1430_v34 = vmax.f32 %v1420_v22, 0.0  ;;  %v1421_v14 = vadd.f32 %v2521_v43, %v1405_v27 }
 0x1a6   : > { %v1702_v63 = vpack.c.bf16 %v1430_v34, %v1430_v34  ;;  %v1431_v18 = vmax.f32 %v1421_v14, 0.0 }
 0x1a8   : > { %1481 = vst.msk [vmem:[%s2529_s20 + $0x20] sm:$0xf] %vm1472_vm8, %v1702_v63  ;;  %v1703_v19 = vpack.c.bf16 %v1431_v18, %v1431_v18 }
 0x1aa   : > { %1482 = vst.msk [vmem:[%s2529_s20 + $0x24] sm:$0xf] %vm1472_vm8, %v1703_v19 }
 0x1ab PF: > { %s13_s14 = sadd.s32 1, %s2031_s14   ;;  %s2577_s12 = smov %s2027_s13 }
 0x1ac   : > { %p10_p5 = scmp.ge.s32.totalorder %s13_s14, 4   ;;  %s2578_s13 = smov %s2580_s15 }
 0x1ae   :  { %12 = sbr.rel (!%p10_p5) target bundleno = 2 (0x2), region = 76 }

</bundles_post_ra>
